<compile_context>
chip_gen: v5e
topology: v5e:2x2
jax: 0.10.0
libtpu: 0.0.40
codegen_flags: <defaults>
</compile_context>

<pallas_src>
import functools

import jax
import jax.numpy as jnp
import numpy as np
from jax.experimental import pallas as pl
from jax.experimental.pallas import tpu as pltpu


def _round_up(v, m):
    return (v + m - 1) // m * m


def _fused_complex_conv_relu_kernel(x_ref, w_ref, b_ref, o_ref):
    # x_ref: (1, TM, Kp)   im2col patches of the original image, [real | imag] features
    # w_ref: (Kp, Np)      block weight matrix [[Wr, Wi], [-Wi, Wr]] (zero-padded)
    # b_ref: (1, Np)       fused bias: [real: b_r-b_i | imag: b_r+b_i] per sub-pixel
    # o_ref: (1, TM, Np)   [real | imag] outputs for the 4 sub-pixels, lane-dense
    acc = jnp.dot(x_ref[0], w_ref[...], preferred_element_type=jnp.float32)
    acc = acc + b_ref[...]                      # (1, Np) broadcast over TM rows
    o_ref[0] = jnp.maximum(acc, 0.0).astype(o_ref.dtype)


def _pick_tile_m(hw, kp, np_, act_bytes):
    """Largest row tile (multiple of 8) whose double-buffered footprint fits VMEM."""
    budget = 12 * 1024 * 1024  # headroom under v5e 16MB / v7x 32MB scoped VMEM
    hw8 = _round_up(hw, 8)
    for tm in (1024, 512, 256, 128, 64, 32, 16, 8):
        if tm > hw8:
            continue
        fp = (2 * tm * kp * act_bytes          # activation tile, double-buffered
              + 2 * tm * np_ * 4               # output tile, double-buffered
              + 2 * kp * np_ * act_bytes)      # weights (grid-invariant)
        if fp <= budget:
            return tm
    return 8


@functools.partial(jax.jit, static_argnames=("scale", "compute_dtype", "tile_m"))
def complex_resize_conv(x, w_r, w_i, b_r, b_i, scale=2,
                        compute_dtype=jnp.float32, tile_m=None):
    """x: (N,2,Cin,H,W); w_*: (Cout,Cin,3,3); b_*: (Cout,). Returns (N,2,Cout,2H,2W)."""
    N, two, Cin, H, W = x.shape
    assert two == 2, "Invalid shape!"
    # TODO(synk): sub-pixel decomposition is specialized to integer scale 2 (the
    #             module's default scale_factor=2.0); other scales not supported.
    assert int(scale) == 2
    Cout = w_r.shape[0]
    HW = H * W
    f32 = jnp.float32

    # ---- sub-pixel collapse of (nearest-2x upsample ∘ 3x3 conv) onto the HxW grid.
    # A[a, r, d]: sub-pixel row offset a in {0,1}, patch row r in {0,1,2} of the
    # padded ORIGINAL image, 3x3-kernel row d in {0,1,2}. Same matrices for columns.
    A = jnp.array([[[1., 0., 0.],
                    [0., 1., 1.],
                    [0., 0., 0.]],
                   [[0., 0., 0.],
                    [1., 1., 0.],
                    [0., 0., 1.]]], dtype=f32)

    def collapse(w):  # (Cout,Cin,3,3) -> (9*Cin, 4*Cout); rows=(r,x,cin), cols=(a,b,cout)
        ws = jnp.einsum('ard,oids,bxs->rxiabo', A, w.astype(f32), A)
        return ws.reshape(9 * Cin, 4 * Cout)

    wr_all = collapse(w_r)
    wi_all = collapse(w_i)
    # Complex conv as one block matmul: [xr | xi] @ [[Wr, Wi], [-Wi, Wr]] = [real | imag]
    w_blk = jnp.concatenate(
        [jnp.concatenate([wr_all, wi_all], axis=1),
         jnp.concatenate([-wi_all, wr_all], axis=1)], axis=0)       # (18*Cin, 8*Cout)

    b_vec = jnp.concatenate([jnp.tile((b_r - b_i).astype(f32), 4),
                             jnp.tile((b_r + b_i).astype(f32), 4)])  # (8*Cout,)

    # ---- im2col (3x3, pad=1) on the ORIGINAL (un-upsampled) image, channels-last.
    # TODO(synk): this slab is ~9x raw input bytes in HBM; it could be eliminated by
    #             doing the 9 shifted-tap matmuls in-kernel with halo'd manual DMA.
    x_cl = jnp.transpose(x, (0, 1, 3, 4, 2))                         # (N,2,H,W,Cin)
    xp = jnp.pad(x_cl, ((0, 0), (0, 0), (1, 1), (1, 1), (0, 0)))
    cols = [xp[:, :, ry:ry + H, rx:rx + W, :] for ry in range(3) for rx in range(3)]
    patches = jnp.concatenate(cols, axis=-1)                         # (N,2,H,W,9*Cin)
    slab = jnp.concatenate([patches[:, 0], patches[:, 1]], axis=-1)  # (N,H,W,18*Cin)
    slab = slab.reshape(N, HW, 18 * Cin)

    # ---- pad K and N(out) lane dims to 128 multiples; tile the spatial dim.
    K = 18 * Cin
    Nout = 8 * Cout
    Kp = _round_up(K, 128)
    Np = _round_up(Nout, 128)
    act_bytes = jnp.dtype(compute_dtype).itemsize
    TM = tile_m if tile_m is not None else _pick_tile_m(HW, Kp, Np, act_bytes)
    Mp = _round_up(HW, TM)

    slab = jnp.pad(slab, ((0, 0), (0, Mp - HW), (0, Kp - K))).astype(compute_dtype)
    w_blk = jnp.pad(w_blk, ((0, Kp - K), (0, Np - Nout))).astype(compute_dtype)
    b_mat = jnp.pad(b_vec, (0, Np - Nout)).reshape(1, Np)            # f32 bias

    grid = (N, Mp // TM)
    cost = pl.CostEstimate(
        flops=int(2 * N * Mp * Kp * Np),
        transcendentals=0,
        bytes_accessed=int(slab.size * act_bytes + w_blk.size * act_bytes
                           + b_mat.size * 4 + N * Mp * Np * x.dtype.itemsize))

    out_flat = pl.pallas_call(
        _fused_complex_conv_relu_kernel,
        out_shape=jax.ShapeDtypeStruct((N, Mp, Np), x.dtype),
        grid_spec=pltpu.PrefetchScalarGridSpec(
            num_scalar_prefetch=0,
            grid=grid,
            in_specs=[
                pl.BlockSpec((1, TM, Kp), lambda n, m: (n, m, 0)),
                pl.BlockSpec((Kp, Np), lambda n, m: (0, 0)),
                pl.BlockSpec((1, Np), lambda n, m: (0, 0)),
            ],
            out_specs=pl.BlockSpec((1, TM, Np), lambda n, m: (n, m, 0)),
        ),
        compiler_params=pltpu.CompilerParams(
            dimension_semantics=("parallel", "parallel"),
            vmem_limit_bytes=32 * 1024 * 1024),
        cost_estimate=cost,
    )(slab, w_blk, b_mat)

    # ---- un-pad and interleave the 4 sub-pixels back into (N, 2, Cout, 2H, 2W).
    out = out_flat[:, :HW, :Nout].reshape(N, H, W, 2, 2, 2, Cout)    # (n,y,x,cplx,a,b,o)
    out = jnp.transpose(out, (0, 3, 6, 1, 4, 2, 5))                  # (n,cplx,o,y,a,x,b)
    return out.reshape(N, 2, Cout, 2 * H, 2 * W)


def _reference(x, w_r, w_i, b_r, b_i, scale=2):
    """Pure-JAX reference matching the PyTorch module (upsample -> complex conv -> ReLU)."""
    up = jnp.repeat(jnp.repeat(x, scale, axis=3), scale, axis=4)
    xr, xi = up[:, 0], up[:, 1]

    def conv(inp, w, b):
        y = jax.lax.conv_general_dilated(
            inp, w, window_strides=(1, 1), padding=((1, 1), (1, 1)),
            dimension_numbers=("NCHW", "OIHW", "NCHW"))
        return y + b[None, :, None, None]

    out_r = conv(xr, w_r, b_r) - conv(xi, w_i, b_i)
    out_i = conv(xi, w_r, b_r) + conv(xr, w_i, b_i)
    return jnp.maximum(jnp.stack([out_r, out_i], axis=1), 0.0)


if __name__ == "__main__":
    N, Cin, Cout, H, W = 2, 4, 4, 8, 8

    key = jax.random.PRNGKey(0)
    k_x, k_wr, k_wi, k_br, k_bi = jax.random.split(key, 5)

    x = jax.random.normal(k_x, (N, 2, Cin, H, W), dtype=jnp.float32)
    w_r = jax.random.normal(k_wr, (Cout, Cin, 3, 3), dtype=jnp.float32) * 0.1
    w_i = jax.random.normal(k_wi, (Cout, Cin, 3, 3), dtype=jnp.float32) * 0.1
    b_r = jax.random.normal(k_br, (Cout,), dtype=jnp.float32) * 0.1
    b_i = jax.random.normal(k_bi, (Cout,), dtype=jnp.float32) * 0.1

    ref = _reference(x, w_r, w_i, b_r, b_i, scale=2)

    # f32 path
    out = complex_resize_conv(x, w_r, w_i, b_r, b_i, scale=2)
    out = jax.block_until_ready(out)
    assert out.shape == (N, 2, Cout, 2 * H, 2 * W), out.shape
    np.testing.assert_allclose(np.asarray(out), np.asarray(ref), rtol=1e-4, atol=1e-4)

    # bf16 storage / MXU path with f32 accumulation (looser tolerance)
    out_bf16 = complex_resize_conv(x, w_r, w_i, b_r, b_i, scale=2,
                                   compute_dtype=jnp.bfloat16)
    out_bf16 = jax.block_until_ready(out_bf16)
    np.testing.assert_allclose(np.asarray(out_bf16), np.asarray(ref),
                               rtol=5e-2, atol=5e-2)

    print("KERNEL_OK")
</pallas_src>

<mosaic_0001>
module attributes {stable_mosaic.version = 11 : i64} {
  func.func @_fused_complex_conv_relu_kernel(%arg0: i32, %arg1: i32, %arg2: memref<1x64x128xf32, #tpu.memory_space<vmem>>, %arg3: memref<128x128xf32, #tpu.memory_space<vmem>>, %arg4: memref<1x128xf32, #tpu.memory_space<vmem>>, %arg5: memref<1x64x128xf32, #tpu.memory_space<vmem>>) attributes {dimension_semantics = [#tpu.dimension_semantics<parallel>, #tpu.dimension_semantics<parallel>], iteration_bounds = array<i64: 2, 1>, scalar_prefetch = 0 : i64, scratch_operands = 0 : i64, tpu.core_type = #tpu.core_type<tc>, window_params = [{transform_indices = @transform_0, window_bounds = array<i64: 1, 64, 128>}, {pipeline_mode = #tpu.pipeline_mode<synchronous>, transform_indices = @transform_1, window_bounds = array<i64: 128, 128>}, {pipeline_mode = #tpu.pipeline_mode<synchronous>, transform_indices = @transform_2, window_bounds = array<i64: 1, 128>}, {transform_indices = @transform_3, window_bounds = array<i64: 1, 64, 128>}]} {
    %c0 = arith.constant 0 : index
    %c0_0 = arith.constant 0 : index
    %c0_1 = arith.constant 0 : index
    %0 = vector.load %arg2[%c0, %c0_0, %c0_1] : memref<1x64x128xf32, #tpu.memory_space<vmem>>, vector<1x64x128xf32>
    %1 = vector.shape_cast %0 : vector<1x64x128xf32> to vector<64x128xf32>
    %c0_2 = arith.constant 0 : index
    %c0_3 = arith.constant 0 : index
    %2 = vector.load %arg3[%c0_2, %c0_3] : memref<128x128xf32, #tpu.memory_space<vmem>>, vector<128x128xf32>
    %cst = arith.constant dense<0.000000e+00> : vector<64x128xf32>
    %3 = tpu.matmul %1, %2, %cst {dimension_numbers = #tpu.dot_dimension_numbers<[1], [0], [0], [1], [0, 0, 1, 1], [], []>} : vector<64x128xf32>, vector<128x128xf32>, vector<64x128xf32> -> vector<64x128xf32>
    %c0_4 = arith.constant 0 : index
    %c0_5 = arith.constant 0 : index
    %4 = vector.load %arg4[%c0_4, %c0_5] : memref<1x128xf32, #tpu.memory_space<vmem>>, vector<1x128xf32>
    %5 = vector.broadcast %4 : vector<1x128xf32> to vector<64x128xf32>
    %6 = arith.addf %3, %5 : vector<64x128xf32>
    %cst_6 = arith.constant 0.000000e+00 : f32
    %7 = vector.broadcast %cst_6 : f32 to vector<64x128xf32>
    %8 = arith.maximumf %6, %7 : vector<64x128xf32>
    %c0_7 = arith.constant 0 : index
    %c0_8 = arith.constant 0 : index
    %c0_9 = arith.constant 0 : index
    %9 = vector.load %arg5[%c0_7, %c0_8, %c0_9] : memref<1x64x128xf32, #tpu.memory_space<vmem>>, vector<1x64x128xf32>
    %10 = vector.shape_cast %9 : vector<1x64x128xf32> to vector<64x128xf32>
    %11 = vector.shape_cast %8 : vector<64x128xf32> to vector<1x64x128xf32>
    tpu.vector_store %arg5[%c0_7, %c0_8, %c0_9], %11 {strides = array<i32>} : memref<1x64x128xf32, #tpu.memory_space<vmem>>, vector<1x64x128xf32>,
    return
  }
  func.func @transform_0(%arg0: i32, %arg1: i32) -> (i32, i32, i32) {
    %c0_i32 = arith.constant 0 : i32
    %c0_i32_0 = arith.constant 0 : i32
    return %arg0, %arg1, %c0_i32 : i32, i32, i32
  }
  func.func @transform_1(%arg0: i32, %arg1: i32) -> (i32, i32) {
    %c0_i32 = arith.constant 0 : i32
    %c0_i32_0 = arith.constant 0 : i32
    %c0_i32_1 = arith.constant 0 : i32
    return %c0_i32, %c0_i32_0 : i32, i32
  }
  func.func @transform_2(%arg0: i32, %arg1: i32) -> (i32, i32) {
    %c0_i32 = arith.constant 0 : i32
    %c0_i32_0 = arith.constant 0 : i32
    %c0_i32_1 = arith.constant 0 : i32
    return %c0_i32, %c0_i32_0 : i32, i32
  }
  func.func @transform_3(%arg0: i32, %arg1: i32) -> (i32, i32, i32) {
    %c0_i32 = arith.constant 0 : i32
    %c0_i32_0 = arith.constant 0 : i32
    return %arg0, %arg1, %c0_i32 : i32, i32, i32
  }
}

</mosaic_0001>

<bundles_post_ra>
// kernel: neg.1
= control target key start
LH: loop header
LB: loop body
LE: loop exit
PB: predicated region body
PF: predicated region fallthrough
CT: control target
= control target key end

     0   :  { %s88_s0 = inlined_call_operand.vmem [shape: f32[36,16], index: 0, kind: input, shape index: {}]   ;;  %s89_s1 = inlined_call_operand.vmem [shape: f32[36,16], index: 1, kind: output, shape index: {}]  }
   0x1   :  { %v2_v0 = vld [vmem:[%s88_s0] sm:$0xff]  ;;  %v40_v1 = vld [vmem:[%s88_s0 + $0x8] sm:$0xff]  ;;  %v42_v2 = vld [vmem:[%s88_s0 + $0x10] sm:$0xff] }
   0x2   :  { %v5_v3 = vxor.u32 2147483648, %v2_v0  ;;  %v12_v4 = vxor.u32 2147483648, %v40_v1  ;;  %v20_v5 = vxor.u32 2147483648, %v42_v2  ;;  %v44_v6 = vld [vmem:[%s88_s0 + $0x18] sm:$0xff]  ;;  %v46_v7 = vld [vmem:[%s88_s0 + $0x20] sm:$0xff] }
   0x3   :  { %v28_v8 = vxor.u32 2147483648, %v44_v6  ;;  %v36_v9 = vxor.u32 2147483648, %v46_v7 }
   0x4   :  { %7 = vst [vmem:[%s89_s1] sm:$0xff] %v5_v3 }
   0x5   :  { %41 = vst [vmem:[%s89_s1 + $0x8] sm:$0xff] %v12_v4 }
   0x6   :  { %43 = vst [vmem:[%s89_s1 + $0x10] sm:$0xff] %v20_v5 }
   0x7   :  { %45 = vst [vmem:[%s89_s1 + $0x18] sm:$0xff] %v28_v8 }
   0x8   :  { %47 = vst [vmem:[%s89_s1 + $0x20] sm:$0xff] %v36_v9 }

// kernel: tile.13
= control target key start
LH: loop header
LB: loop body
LE: loop exit
PB: predicated region body
PF: predicated region fallthrough
CT: control target
= control target key end

     0   :  { %s22_s0 = inlined_call_operand.vmem [shape: f32[4], index: 0, kind: input, shape index: {}]   ;;  %s23_s1 = inlined_call_operand.vmem [shape: f32[4,4], index: 1, kind: output, shape index: {}]  }
   0x1   :  { %v4_v0 = vld [vmem:[%s22_s0] ss:$0 sm:$0xff] }
   0x2   :  { %5 = vst [vmem:[%s23_s1] sm:$0xf] %v4_v0 }

// kernel: tile.14
= control target key start
LH: loop header
LB: loop body
LE: loop exit
PB: predicated region body
PF: predicated region fallthrough
CT: control target
= control target key end

     0   :  { %s37_s8 = smov 4   ;;  %s38_s9 = smov 8   ;;  %vm7_vm0 = vcmask 31744   ;;  %vm13_vm1 = vcmask 130144   ;;  %vm19_vm2 = vcmask 97344   ;;  %vm25_vm3 = vcmask 64544   ;;  %s55_s0 = inlined_call_operand.vmem [shape: f32[4,4], index: 0, kind: input, shape index: {}]   ;;  %s56_s1 = inlined_call_operand.vmem [shape: f32[16], index: 1, kind: output, shape index: {}]  }
   0x1   :  { %v4_v0 = vld [vmem:[%s55_s0] sm:$0xf]  ;;  %s36_s0 = smov 12  }
   0x2   :  { %5 = vst [vmem:[#allocation1] sm:$0xf] %v4_v0 }
   0x9   :  { %v10_v1 = vld [vmem:[#allocation1 + $0x3] sm:$0x1]   ;;  %v22_v2 = vld [vmem:[#allocation1 + $0x1] sm:$0x1]   ;;  %v16_v3 = vld [vmem:[#allocation1 + $0x2] sm:$0x1]  }
   0xa   :  { %11 = vrot.lane.b32.xlu0 %v10_v1, %s36_s0  ;;  %23 = vrot.lane.b32.xlu1 %v22_v2, %s37_s8  ;;  %v6_v4 = vld [vmem:[#allocation1] sm:$0x1]  }
   0xb   :  { %8 = vst.msk [vmem:[#allocation0] sm:$0x1] %vm7_vm0, %v6_v4  }
  0x12   :  { %17 = vrot.lane.b32.xlu0 %v16_v3, %s38_s9 }
  0x7c   :  { %v12_v5 = vpop.permute.xlu0 %11   ;;  %v24_v6 = vpop.permute.xlu1 %23  }
  0x7d   :  { %14 = vst.msk [vmem:[#allocation0] sm:$0x1] %vm13_vm1, %v12_v5  }
  0x84   :  { %v18_v7 = vpop.permute.xlu0 %17  }
  0x85   :  { %20 = vst.msk [vmem:[#allocation0] sm:$0x1] %vm19_vm2, %v18_v7  }
  0x86   :  { %26 = vst.msk [vmem:[#allocation0] sm:$0x1] %vm25_vm3, %v24_v6  }
  0x8d   :  { %v29_v8 = vld [vmem:[#allocation0] sm:$0x1] }
  0x8e   :  { %32 = vst [vmem:[%s56_s1] sm:$0x1] %v29_v8 }

// kernel: complex_resize_conv.1
= control target key start
LH: loop header
LB: loop body
LE: loop exit
PB: predicated region body
PF: predicated region fallthrough
CT: control target
= control target key end

     0   :  { %s512_s12 = smov 0   ;;  %s514_s13 = smov 0   ;;  %s607_s0 = inlined_call_operand.vmem [shape: f32[2,64,128], index: 0, kind: input, shape index: {}]   ;;  %s608_s1 = inlined_call_operand.vmem [shape: f32[128,128], index: 1, kind: input, shape index: {}]   ;;  %s609_s2 = inlined_call_operand.vmem [shape: f32[1,128], index: 2, kind: input, shape index: {}]   ;;  %s610_s3 = inlined_call_operand.vmem [shape: f32[2,64,128], index: 3, kind: output, shape index: {}]  }
   0x1   :  { %s516_s14 = smov 0  }
   0x2 LB: > { %s25_s15 = sadd.s32 1, %s486_s13  ;;  %p386_p0 = scmp.ge.s32.totalorder %s490_s14, 1  ;;  %s490_s14 = sphi %s516_s14, %s13_s14   ;;  %s486_s13 = sphi %s514_s13, %s612_s13   ;;  %s482_s12 = sphi %s512_s12, %s611_s12  }
   0x3   : > { %p27_p1 = scmp.ge.s32.totalorder %s25_s15, 2  ;;  %p158_p2 = scmp.lt.s32.totalorder %s490_s14, 3 }
   0x5   : > { %s614_s15 = smov (%p27_p1, %s25_s15), 0  ;;  %p159_p3 = pnand %p386_p0, %p158_p2 }
   0x6   : > { %p191_p4 = scmp.lt.s32.totalorder (!%p159_p3), %s482_s12, 1 }
   0x7   : > { %162 = sbr.rel (%p159_p3) target bundleno = 190 (0xbe), region = 32 }
   0xc   : > { %v233_v0 = vld [vmem:[%s608_s1 + $0x78] sm:$0xff]  ;;  %v232_v1 = vld [vmem:[%s608_s1 + $0x70] sm:$0xff]  ;;  %v231_v2 = vld [vmem:[%s608_s1 + $0x68] sm:$0xff]  ;;  %s616_s12 = smov (!%p191_p4, %s482_s12), 1 }
   0xd   : > { %396 = vmatpush.msra.mxu2 %v233_v0  ;;  %397 = vmatpush.msra.mxu3 %v233_v0  ;;  %v230_v3 = vld [vmem:[%s608_s1 + $0x60] sm:$0xff]  ;;  %v229_v4 = vld [vmem:[%s608_s1 + $0x58] sm:$0xff]  ;;  %v228_v5 = vld [vmem:[%s608_s1 + $0x50] sm:$0xff]  ;;  %s393_s19 = sshll.u32 %s616_s12, 6 }
   0xe   : > { %238 = vmatpush.msra.mxu0 %v233_v0  ;;  %395 = vmatpush.msra.mxu1 %v233_v0  ;;  %v227_v6 = vld [vmem:[%s608_s1 + $0x48] sm:$0xff]  ;;  %v226_v7 = vld [vmem:[%s608_s1 + $0x40] sm:$0xff]  ;;  %v225_v8 = vld [vmem:[%s608_s1 + $0x38] sm:$0xff]  ;;  %s198_s26 = scalar_lea.vmem %s607_s0, %s393_s19  ;;  %s208_s6 = scalar_lea.vmem %s610_s3, %s393_s19 }
   0xf   : > { %399 = vmatpush.msra.mxu2 %v232_v1  ;;  %400 = vmatpush.msra.mxu3 %v232_v1  ;;  %v224_v9 = vld [vmem:[%s608_s1 + $0x30] sm:$0xff]  ;;  %v223_v10 = vld [vmem:[%s608_s1 + $0x28] sm:$0xff]  ;;  %v222_v11 = vld [vmem:[%s608_s1 + $0x20] sm:$0xff] }
  0x10   : > { %239 = vmatpush.msra.mxu0 %v232_v1  ;;  %398 = vmatpush.msra.mxu1 %v232_v1  ;;  %v221_v12 = vld [vmem:[%s608_s1 + $0x18] sm:$0xff]  ;;  %v220_v13 = vld [vmem:[%s608_s1 + $0x10] sm:$0xff]  ;;  %v219_v14 = vld [vmem:[%s608_s1 + $0x8] sm:$0xff] }
  0x11   : > { %402 = vmatpush.msra.mxu2 %v231_v2  ;;  %403 = vmatpush.msra.mxu3 %v231_v2  ;;  %v218_v15 = vld [vmem:[%s608_s1] sm:$0xff]  ;;  %v216_v17 = vld [vmem:[%s198_s26 + $0x30] sm:$0xff]  ;;  %v215_v20 = vld [vmem:[%s198_s26 + $0x28] sm:$0xff] }
  0x12   : > { %240 = vmatpush.msra.mxu0 %v231_v2  ;;  %401 = vmatpush.msra.mxu1 %v231_v2  ;;  %v214_v16 = vld [vmem:[%s198_s26 + $0x20] sm:$0xff]  ;;  %v212_v19 = vld [vmem:[%s198_s26 + $0x10] sm:$0xff]  ;;  %v217_v21 = vld [vmem:[%s198_s26 + $0x38] sm:$0xff] }
  0x13   : > { %405 = vmatpush.msra.mxu2 %v230_v3  ;;  %406 = vmatpush.msra.mxu3 %v230_v3  ;;  %v210_v18 = vld [vmem:[%s198_s26] sm:$0xff]  ;;  %v211_v22 = vld [vmem:[%s198_s26 + $0x8] sm:$0xff]  ;;  %v213_v23 = vld [vmem:[%s198_s26 + $0x18] sm:$0xff] }
  0x14   : > { %241 = vmatpush.msra.mxu0 %v230_v3  ;;  %404 = vmatpush.msra.mxu1 %v230_v3  ;;  %v467_v24 = vld [vmem:[%s609_s2] ss:$0 sm:$0xff] }
  0x15   : > { %408 = vmatpush.msra.mxu2 %v229_v4  ;;  %409 = vmatpush.msra.mxu3 %v229_v4 }
  0x16   : > { %242 = vmatpush.msra.mxu0 %v229_v4  ;;  %407 = vmatpush.msra.mxu1 %v229_v4 }
  0x17   : > { %411 = vmatpush.msra.mxu2 %v228_v5  ;;  %412 = vmatpush.msra.mxu3 %v228_v5 }
  0x18   : > { %243 = vmatpush.msra.mxu0 %v228_v5  ;;  %410 = vmatpush.msra.mxu1 %v228_v5 }
  0x19   : > { %414 = vmatpush.msra.mxu2 %v227_v6  ;;  %415 = vmatpush.msra.mxu3 %v227_v6 }
  0x1a   : > { %244 = vmatpush.msra.mxu0 %v227_v6  ;;  %413 = vmatpush.msra.mxu1 %v227_v6 }
  0x1b   : > { %417 = vmatpush.msra.mxu2 %v226_v7  ;;  %418 = vmatpush.msra.mxu3 %v226_v7 }
  0x1c   : > { %245 = vmatpush.msra.mxu0 %v226_v7  ;;  %416 = vmatpush.msra.mxu1 %v226_v7 }
  0x1d   : > { %420 = vmatpush.msra.mxu2 %v225_v8  ;;  %421 = vmatpush.msra.mxu3 %v225_v8 }
  0x1e   : > { %246 = vmatpush.msra.mxu0 %v225_v8  ;;  %419 = vmatpush.msra.mxu1 %v225_v8 }
  0x1f   : > { %423 = vmatpush.msra.mxu2 %v224_v9  ;;  %424 = vmatpush.msra.mxu3 %v224_v9 }
  0x20   : > { %247 = vmatpush.msra.mxu0 %v224_v9  ;;  %422 = vmatpush.msra.mxu1 %v224_v9 }
  0x21   : > { %426 = vmatpush.msra.mxu2 %v223_v10  ;;  %427 = vmatpush.msra.mxu3 %v223_v10 }
  0x22   : > { %248 = vmatpush.msra.mxu0 %v223_v10  ;;  %425 = vmatpush.msra.mxu1 %v223_v10 }
  0x23   : > { %429 = vmatpush.msra.mxu2 %v222_v11  ;;  %430 = vmatpush.msra.mxu3 %v222_v11 }
  0x24   : > { %249 = vmatpush.msra.mxu0 %v222_v11  ;;  %428 = vmatpush.msra.mxu1 %v222_v11 }
  0x25   : > { %432 = vmatpush.msra.mxu2 %v221_v12  ;;  %433 = vmatpush.msra.mxu3 %v221_v12 }
  0x26   : > { %250 = vmatpush.msra.mxu0 %v221_v12  ;;  %431 = vmatpush.msra.mxu1 %v221_v12 }
  0x27   : > { %435 = vmatpush.msra.mxu2 %v220_v13  ;;  %436 = vmatpush.msra.mxu3 %v220_v13 }
  0x28   : > { %251 = vmatpush.msra.mxu0 %v220_v13  ;;  %434 = vmatpush.msra.mxu1 %v220_v13 }
  0x29   : > { %438 = vmatpush.msra.mxu2 %v219_v14  ;;  %439 = vmatpush.msra.mxu3 %v219_v14 }
  0x2a   : > { %252 = vmatpush.msra.mxu0 %v219_v14  ;;  %437 = vmatpush.msra.mxu1 %v219_v14 }
  0x2b   : > { %441 = vmatpush.msra.mxu2 %v218_v15  ;;  %442 = vmatpush.msra.mxu3 %v218_v15 }
  0x2c   : > { %266 = vmatmul.f32.vlgmr.msra.gmra.mxu2 %v214_v16  ;;  %272 = vmatmul.f32.vlgmr.msra.gmra.mxu3 %v216_v17 }
  0x2d   : > { %253 = vmatpush.msra.mxu0 %v218_v15  ;;  %440 = vmatpush.msra.mxu1 %v218_v15 }
  0x2e   : > { %254 = vmatmul.f32.vlgmr.msra.gmra.mxu0 %v210_v18  ;;  %260 = vmatmul.f32.vlgmr.msra.gmra.mxu1 %v212_v19 }
  0x34   : > { %269 = vmatmul.f32.gmra.mxu2 %v215_v20  ;;  %275 = vmatmul.f32.gmra.mxu3 %v217_v21 }
  0x36   : > { %257 = vmatmul.f32.gmra.mxu0 %v211_v22  ;;  %263 = vmatmul.f32.gmra.mxu1 %v213_v23 }
  0xab   : > { %v255_v25 = vpop.f32.mrf.mxu0  ;;  %v261_v26 = vpop.f32.mrf.mxu1 }
  0xac   : > { %v256_v27 = vadd.f32 %v467_v24, %v255_v25  ;;  %v262_v28 = vadd.f32 %v467_v24, %v261_v26 }
  0xae   : > { %v279_v29 = vmax.f32 %v256_v27, 0.0  ;;  %v281_v30 = vmax.f32 %v262_v28, 0.0 }
  0xaf   : > { %v267_v31 = vpop.f32.mrf.mxu2  ;;  %v273_v32 = vpop.f32.mrf.mxu3 }
  0xb0   : > { %287 = vst [vmem:[%s208_s6] sm:$0xff] %v279_v29  ;;  %v268_v33 = vadd.f32 %v467_v24, %v267_v31  ;;  %v274_v34 = vadd.f32 %v467_v24, %v273_v32 }
  0xb1   : > { %289 = vst [vmem:[%s208_s6 + $0x10] sm:$0xff] %v281_v30 }
  0xb2   : > { %v283_v35 = vmax.f32 %v268_v33, 0.0  ;;  %v285_v36 = vmax.f32 %v274_v34, 0.0 }
  0xb3   : > { %v258_v37 = vpop.f32.mrf.mxu0  ;;  %v264_v38 = vpop.f32.mrf.mxu1 }
  0xb4   : > { %291 = vst [vmem:[%s208_s6 + $0x20] sm:$0xff] %v283_v35  ;;  %v259_v39 = vadd.f32 %v467_v24, %v258_v37  ;;  %v265_v40 = vadd.f32 %v467_v24, %v264_v38 }
  0xb5   : > { %293 = vst [vmem:[%s208_s6 + $0x30] sm:$0xff] %v285_v36 }
  0xb6   : > { %v280_v41 = vmax.f32 %v259_v39, 0.0  ;;  %v282_v42 = vmax.f32 %v265_v40, 0.0 }
  0xb7   : > { %v270_v43 = vpop.f32.mrf.mxu2  ;;  %v276_v44 = vpop.f32.mrf.mxu3 }
  0xb8   : > { %288 = vst [vmem:[%s208_s6 + $0x8] sm:$0xff] %v280_v41  ;;  %v271_v45 = vadd.f32 %v467_v24, %v270_v43  ;;  %v277_v46 = vadd.f32 %v467_v24, %v276_v44 }
  0xb9   : > { %290 = vst [vmem:[%s208_s6 + $0x18] sm:$0xff] %v282_v42 }
  0xba   : > { %v284_v47 = vmax.f32 %v271_v45, 0.0  ;;  %v286_v48 = vmax.f32 %v277_v46, 0.0 }
  0xbc   : > { %292 = vst [vmem:[%s208_s6 + $0x28] sm:$0xff] %v284_v47 }
  0xbd   : > { %294 = vst [vmem:[%s208_s6 + $0x38] sm:$0xff] %v286_v48 }
  0xbe PF: > { %s13_s14 = sadd.s32 1, %s490_s14   ;;  %s611_s12 = smov %s486_s13 }
  0xbf   : > { %p10_p5 = scmp.ge.s32.totalorder %s13_s14, 4   ;;  %s612_s13 = smov %s614_s15 }
  0xc1   :  { %12 = sbr.rel (!%p10_p5) target bundleno = 2 (0x2), region = 62 }

</bundles_post_ra>
